<compile_context>
chip_gen: v7x
topology: tpu7x:2x2x1
jax: 0.10.0
libtpu: 0.0.40
codegen_flags: <defaults>
</compile_context>

<pallas_src>
import jax
import jax.numpy as jnp
from jax import lax
from jax.experimental import pallas as pl
from jax.experimental.pallas import tpu as pltpu

# Problem sizes (from the module definition / example input)
C_IN = 1
C_OUT = 4
KH = KW = 5
H = W = 10
OH = H - KH + 1          # 6
OW = W - KW + 1          # 6
HW = H * W               # 100 (contraction dim)
OUT_COLS = C_OUT * OH * OW   # 144 (output feature dim, NCHW-flattened)


def _round_up(x, m):
    return (x + m - 1) // m * m


def conv_tanh_kernel(x_ref, w_ref, b_ref, o_ref):
    """One batch tile per grid step.

    x_ref: (nt, HW)        VMEM f32  rows = images, cols = input pixels h*W+w
    w_ref: (HW, OUT_COLS)  VMEM f32  dense conv-as-matmul weight matrix
    b_ref: (1, OUT_COLS)   VMEM f32  bias broadcast row
    o_ref: (nt, OUT_COLS)  VMEM f32  cols = co*OH*OW + oh*OW + ow  (NCHW order)
    """
    acc = jnp.dot(x_ref[...], w_ref[...], preferred_element_type=jnp.float32)
    o_ref[...] = jnp.tanh(acc + b_ref[...])


def _build_conv_matrix(weight):
    """Lower the 5x5 VALID conv to a dense (HW, OUT_COLS) f32 matrix."""
    co, oh, ow, kh, kw = jnp.meshgrid(
        jnp.arange(C_OUT), jnp.arange(OH), jnp.arange(OW),
        jnp.arange(KH), jnp.arange(KW), indexing="ij")
    rows = (oh + kh) * W + (ow + kw)                 # input pixel index
    cols = co * (OH * OW) + oh * OW + ow             # output feature index
    vals = weight.astype(jnp.float32)[co, 0, kh, kw]
    w_mat = jnp.zeros((HW, OUT_COLS), dtype=jnp.float32)
    return w_mat.at[rows.ravel(), cols.ravel()].set(vals.ravel())


def _choose_tile(n, n_tile):
    """Sublane-aligned batch tile; prefer >= 2 grid steps (v7x megacore)."""
    n_tile = max(8, _round_up(int(n_tile), 8))
    n_aligned = _round_up(max(n, 1), 8)
    nt = min(n_tile, n_aligned)
    if n_aligned <= nt and n >= 16:
        # Whole batch fits in one tile: split it in two so both v7x cores work.
        nt = _round_up((n + 1) // 2, 8)
    return nt


def model_tanh_forward(x_nchw, weight, bias, n_tile=1024):
    """x_nchw: (N, 1, H, W) f32; weight: (C_OUT, 1, KH, KW); bias: (C_OUT,)."""
    N = x_nchw.shape[0]
    assert x_nchw.shape[1:] == (C_IN, H, W)

    nt = _choose_tile(N, n_tile)
    n_pad = _round_up(N, nt)

    # Free reshape (contiguous); only the small batch tail gets zero-padded.
    x_flat = x_nchw.astype(jnp.float32).reshape(N, HW)
    if n_pad != N:
        x_flat = jnp.pad(x_flat, ((0, n_pad - N), (0, 0)))

    w_mat = _build_conv_matrix(weight)                       # (100, 144)
    b_row = bias.astype(jnp.float32).reshape(1, OUT_COLS // C_OUT * 0 + OUT_COLS) \
        if False else jnp.repeat(bias.astype(jnp.float32), OH * OW).reshape(1, OUT_COLS)

    y_flat = pl.pallas_call(
        conv_tanh_kernel,
        out_shape=jax.ShapeDtypeStruct((n_pad, OUT_COLS), jnp.float32),
        grid_spec=pltpu.PrefetchScalarGridSpec(
            num_scalar_prefetch=0,
            grid=(n_pad // nt,),
            in_specs=[
                pl.BlockSpec((nt, HW), lambda n: (n, 0)),
                pl.BlockSpec((HW, OUT_COLS), lambda n: (0, 0)),
                pl.BlockSpec((1, OUT_COLS), lambda n: (0, 0)),
            ],
            out_specs=pl.BlockSpec((nt, OUT_COLS), lambda n: (n, 0)),
        ),
        compiler_params=pltpu.CompilerParams(
            dimension_semantics=("parallel",)),
    )(x_flat, w_mat, b_row)

    # (n_pad, 144) -> slice off batch padding -> NCHW (N, C_OUT, OH, OW).
    return y_flat[:N].reshape(N, C_OUT, OH, OW)


def reference_forward(x_nchw, weight, bias):
    y = lax.conv_general_dilated(
        x_nchw, weight,
        window_strides=(1, 1), padding="VALID",
        dimension_numbers=("NCHW", "OIHW", "NCHW"))
    return jnp.tanh(y + bias.reshape(1, C_OUT, 1, 1))


if __name__ == "__main__":
    key = jax.random.PRNGKey(0)
    k_x, k_w, k_b = jax.random.split(key, 3)

    # Small shapes consistent with the module (batch=2 instead of 1).
    N = 2
    x = jax.random.normal(k_x, (N, C_IN, H, W), dtype=jnp.float32)

    # Deterministic parameter init (PyTorch-style uniform bound 1/sqrt(fan_in)).
    fan_in = C_IN * KH * KW
    bound = 1.0 / (fan_in ** 0.5)
    weight = jax.random.uniform(k_w, (C_OUT, C_IN, KH, KW),
                                minval=-bound, maxval=bound, dtype=jnp.float32)
    bias = jax.random.uniform(k_b, (C_OUT,),
                              minval=-bound, maxval=bound, dtype=jnp.float32)

    y = jax.block_until_ready(model_tanh_forward(x, weight, bias))
    y_ref = reference_forward(x, weight, bias)
    assert y.shape == (N, C_OUT, OH, OW)
    assert jnp.allclose(y, y_ref, atol=1e-5, rtol=1e-5)

    # Multi-tile sanity check (exercises grid > 1 and batch padding).
    N2 = 300
    x2 = jax.random.normal(k_x, (N2, C_IN, H, W), dtype=jnp.float32)
    y2 = jax.block_until_ready(model_tanh_forward(x2, weight, bias, n_tile=128))
    y2_ref = reference_forward(x2, weight, bias)
    assert jnp.allclose(y2, y2_ref, atol=1e-5, rtol=1e-5)

    print("KERNEL_OK")
</pallas_src>

<mosaic_0001>
module attributes {stable_mosaic.version = 11 : i64} {
  func.func @conv_tanh_kernel(%arg0: i32, %arg1: memref<8x100xf32, #tpu.memory_space<vmem>>, %arg2: memref<100x144xf32, #tpu.memory_space<vmem>>, %arg3: memref<1x144xf32, #tpu.memory_space<vmem>>, %arg4: memref<8x144xf32, #tpu.memory_space<vmem>>) attributes {dimension_semantics = [#tpu.dimension_semantics<parallel>], iteration_bounds = array<i64: 1>, scalar_prefetch = 0 : i64, scratch_operands = 0 : i64, tpu.core_type = #tpu.core_type<tc>, window_params = [{transform_indices = @transform_0, window_bounds = array<i64: 8, 100>}, {pipeline_mode = #tpu.pipeline_mode<synchronous>, transform_indices = @transform_1, window_bounds = array<i64: 100, 144>}, {pipeline_mode = #tpu.pipeline_mode<synchronous>, transform_indices = @transform_2, window_bounds = array<i64: 1, 144>}, {transform_indices = @transform_3, window_bounds = array<i64: 8, 144>}]} {
    %c0 = arith.constant 0 : index
    %c0_0 = arith.constant 0 : index
    %0 = vector.load %arg1[%c0, %c0_0] : memref<8x100xf32, #tpu.memory_space<vmem>>, vector<8x100xf32>
    %c0_1 = arith.constant 0 : index
    %c0_2 = arith.constant 0 : index
    %1 = vector.load %arg2[%c0_1, %c0_2] : memref<100x144xf32, #tpu.memory_space<vmem>>, vector<100x144xf32>
    %cst = arith.constant dense<0.000000e+00> : vector<8x144xf32>
    %2 = tpu.matmul %0, %1, %cst {dimension_numbers = #tpu.dot_dimension_numbers<[1], [0], [0], [1], [0, 0, 1, 1], [], []>} : vector<8x100xf32>, vector<100x144xf32>, vector<8x144xf32> -> vector<8x144xf32>
    %c0_3 = arith.constant 0 : index
    %c0_4 = arith.constant 0 : index
    %3 = vector.load %arg3[%c0_3, %c0_4] : memref<1x144xf32, #tpu.memory_space<vmem>>, vector<1x144xf32>
    %4 = vector.broadcast %3 : vector<1x144xf32> to vector<8x144xf32>
    %5 = arith.addf %2, %4 : vector<8x144xf32>
    %6 = math.tanh %5 : vector<8x144xf32>
    %c0_5 = arith.constant 0 : index
    %c0_6 = arith.constant 0 : index
    %7 = vector.load %arg4[%c0_5, %c0_6] : memref<8x144xf32, #tpu.memory_space<vmem>>, vector<8x144xf32>
    tpu.vector_store %arg4[%c0_5, %c0_6], %6 {strides = array<i32>} : memref<8x144xf32, #tpu.memory_space<vmem>>, vector<8x144xf32>,
    return
  }
  func.func @transform_0(%arg0: i32) -> (i32, i32) {
    %c0_i32 = arith.constant 0 : i32
    %c0_i32_0 = arith.constant 0 : i32
    return %arg0, %c0_i32 : i32, i32
  }
  func.func @transform_1(%arg0: i32) -> (i32, i32) {
    %c0_i32 = arith.constant 0 : i32
    %c0_i32_0 = arith.constant 0 : i32
    %c0_i32_1 = arith.constant 0 : i32
    return %c0_i32, %c0_i32_0 : i32, i32
  }
  func.func @transform_2(%arg0: i32) -> (i32, i32) {
    %c0_i32 = arith.constant 0 : i32
    %c0_i32_0 = arith.constant 0 : i32
    %c0_i32_1 = arith.constant 0 : i32
    return %c0_i32, %c0_i32_0 : i32, i32
  }
  func.func @transform_3(%arg0: i32) -> (i32, i32) {
    %c0_i32 = arith.constant 0 : i32
    %c0_i32_0 = arith.constant 0 : i32
    return %arg0, %c0_i32 : i32, i32
  }
}

</mosaic_0001>

<bundles_post_ra>
// kernel: tpu_custom_call.1
= control target key start
LH: loop header
LB: loop body
LE: loop exit
PB: predicated region body
PF: predicated region fallthrough
CT: control target
= control target key end

     0   :  { %v212_v7 = vmov 0.0   ;;  %s330_s0 = inlined_call_operand.vmem [shape: f32[8,100], index: 0, kind: input, shape index: {}]   ;;  %s331_s1 = inlined_call_operand.vmem [shape: f32[100,144], index: 1, kind: input, shape index: {}]   ;;  %s332_s2 = inlined_call_operand.vmem [shape: f32[1,144], index: 2, kind: input, shape index: {}]   ;;  %s333_s3 = inlined_call_operand.hbm [shape: f32[8,144], index: 3, kind: output, shape index: {}]  }
   0x1   :  { %v17_v0 = vld [vmem:[%s331_s1 + $0x8] sm:$0xff]  ;;  %v19_v1 = vld [vmem:[%s331_s1 + $0x18] sm:$0xff]  ;;  %v16_v2 = vld [vmem:[%s331_s1] sm:$0xff]  ;;  %129 = vmatprep.mubr.f32.mxu0 %v212_v7 }
   0x2   :  { %v158_v3 = vpack.c.bf16 %v19_v1, %v17_v0  ;;  %v18_v4 = vld [vmem:[%s331_s1 + $0x10] sm:$0xff]  ;;  %v21_v5 = vld [vmem:[%s331_s1 + $0x28] sm:$0xff]  ;;  %v23_v6 = vld [vmem:[%s331_s1 + $0x38] sm:$0xff] }
   0x3   :  { %v160_v8 = vpack.c.bf16 %v18_v4, %v16_v2  ;;  %v162_v9 = vpack.c.bf16 %v23_v6, %v21_v5  ;;  %v20_v10 = vld [vmem:[%s331_s1 + $0x20] sm:$0xff]  ;;  %v22_v11 = vld [vmem:[%s331_s1 + $0x30] sm:$0xff]  ;;  %v25_v12 = vld [vmem:[%s331_s1 + $0x48] sm:$0xff] }
   0x4   :  { %159 = vmatprep.subr.bf16.mxu0 %v158_v3  ;;  %v27_v13 = vld [vmem:[%s331_s1 + $0x58] sm:$0xff]  ;;  %v164_v14 = vpack.c.bf16 %v22_v11, %v20_v10  ;;  %v24_v16 = vld [vmem:[%s331_s1 + $0x40] sm:$0xff]  ;;  %v26_v17 = vld [vmem:[%s331_s1 + $0x50] sm:$0xff] }
   0x5   :  { %161 = vmatpush1.bf16.msra.mxu0 %v160_v8  ;;  %v166_v15 = vpack.c.bf16 %v27_v13, %v25_v12  ;;  %v29_v18 = vld [vmem:[%s331_s1 + $0x68] sm:$0xff]  ;;  %v31_v19 = vld [vmem:[%s331_s1 + $0x78] sm:$0xff]  ;;  %v168_v20 = vpack.c.bf16 %v26_v17, %v24_v16  ;;  %v28_v22 = vld [vmem:[%s331_s1 + $0x60] sm:$0xff] }
   0x6   :  { %163 = vmatprep.subr.bf16.mxu0 %v162_v9  ;;  %v170_v21 = vpack.c.bf16 %v31_v19, %v29_v18  ;;  %v30_v23 = vld [vmem:[%s331_s1 + $0x70] sm:$0xff] }
   0x9   :  { %165 = vmatpush1.bf16.msra.mxu0 %v164_v14 }
   0xa   :  { %167 = vmatprep.subr.bf16.mxu0 %v166_v15 }
   0xb   :  { %8 = vsyncpa [#allocation3], 0  ;;  %v33_v24 = vld [vmem:[%s331_s1 + $0x88] sm:$0xff]  ;;  %v35_v25 = vld [vmem:[%s331_s1 + $0x98] sm:$0xff]  ;;  %v172_v26 = vpack.c.bf16 %v30_v23, %v28_v22  ;;  %vm58_vm0 = vcmask 1043456   ;;  %vm54_vm1 = vcmask 818176   ;;  %v44_v40 = vlaneseq }
   0xc   :  { %v174_v27 = vpack.c.bf16 %v35_v25, %v33_v24  ;;  %v32_v28 = vld [vmem:[%s331_s1 + $0x80] sm:$0xff]  ;;  %v34_v29 = vld [vmem:[%s331_s1 + $0x90] sm:$0xff]  ;;  %v37_v30 = vld [vmem:[%s331_s1 + $0xa8] sm:$0xff]  ;;  %vm139_vm2 = vcmask 130048  }
   0xd   :  { %169 = vmatpush1.bf16.msra.mxu0 %v168_v20  ;;  %v39_v31 = vld [vmem:[%s331_s1 + $0xb8] sm:$0xff]  ;;  %v176_v32 = vpack.c.bf16 %v34_v29, %v32_v28  ;;  %v36_v34 = vld [vmem:[%s331_s1 + $0xa0] sm:$0xff]  ;;  %v38_v35 = vld [vmem:[%s331_s1 + $0xb0] sm:$0xff]  ;;  %v45_v41 = vshrl.u32 %v44_v40, 7 }
   0xe   :  { %171 = vmatprep.subr.bf16.mxu0 %v170_v21  ;;  %v178_v33 = vpack.c.bf16 %v39_v31, %v37_v30  ;;  %v180_v36 = vpack.c.bf16 %v38_v35, %v36_v34  ;;  %v41_v37 = vld [vmem:[%s331_s1 + $0xc8] sm:$0xf]  ;;  %v40_v38 = vld [vmem:[%s331_s1 + $0xc0] sm:$0xf] }
   0xf   :  { %v15_v39 = vld [vmem:[%s330_s0] sm:$0xff]  ;;  %v46_v42 = vsub.s32 0, %v45_v41  ;;  %v50_v44 = vsub.s32 1, %v45_v41  ;;  %s213_s0 = smov [#allocation2]  }
  0x10   :  { %v42_v43 = vld [vmem:[%s332_s2] sm:$0x3]  ;;  %s147_s1 = sshll.u32 %s213_s0, 4  ;;  %s148_s1 = int_to_ptr.vmem [resolvable:$true] %s147_s1 }
  0x11   :  { %173 = vmatpush1.bf16.msra.mxu0 %v172_v26  ;;  %v47_v45 = vrot.slane %v42_v43, %v46_v42  ;;  %v51_v46 = vrot.slane %v42_v43, %v50_v44  ;;  %s188_s14 = scalar_lea.vmem %s148_s1, 256  ;;  %p193_p1 = scmp.lt.s32.totalorder %s148_s1, %s148_s1 }
  0x12   :  { %175 = vmatprep.subr.bf16.mxu0 %v174_v27  ;;  %p189_p0 = scmp.ne.s32.totalorder %s148_s1, %s188_s14  ;;  %p194_p2 = scmp.lt.s32.totalorder %s188_s14, %s188_s14 }
  0x14   :  { %p195_p3 = por %p194_p2, %p193_p1 }
  0x15   :  { %177 = vmatpush1.bf16.msra.mxu0 %v176_v32 }
  0x16   :  { %179 = vmatprep.subr.bf16.mxu0 %v178_v33  ;;  %p196_p4 = pnand %p195_p3, %p189_p0 }
  0x19   :  { %181 = vmatpush1.bf16.msra.mxu0 %v180_v36 }
  0x1a   :  { %155 = vmatprep.subr.msk.mxu0 %vm58_vm0, %v41_v37 }
  0x1d   :  { %156 = vmatpush1.msk.msra.mxu0 %vm58_vm0, %v40_v38 }
  0x1e   :  { %157 = vmatmul.mubr.msk.f32.vlgmr.msra.gmra.mrb[0].mxu0 %vm54_vm1, %v15_v39 }
  0xf1   :  { %v131_v47 = vpop.f32.mrb[0].mxu0 }
  0xf2   :  { %v132_v48 = vadd.f32 %v131_v47, %v47_v45  ;;  %v133_v49 = vpop.f32.mrb[1].mxu0 }
  0xf3   :  { %v134_v50 = vadd.f32 %v133_v49, %v51_v46 }
  0xf4   :  { %184 = vtanh.f32 %v132_v48 }
  0xf5   :  { %186 = vtanh.f32 %v134_v50 }
  0xfe   :  { %v185_v51 = vpop.eup %184 }
  0xff   :  { %v187_v52 = vpop.eup %186  ;;  %138 = vst [vmem:[#allocation2] sm:$0xff] %v185_v51 }
 0x100   :  { %140 = vst.msk [vmem:[#allocation2 + $0x8] sm:$0xff] %vm139_vm2, %v187_v52 }
 0x101   :  { %199 = shalt.err (!%p196_p4)
}
 0x102   :  { %s200_s16 = scalar_lea.hbm %s333_s3, 256 }
 0x103   :  { %p201_p5 = scmp.ne.s32.totalorder %s333_s3, %s200_s16  ;;  %p204_p6 = scmp.lt.u32.totalorder %s200_s16, %s333_s3 }
 0x105   :  { %p206_p7 = pnand %p204_p6, %p201_p5 }
 0x107   :  { %209 = shalt.err (!%p206_p7)
}
 0x108   :  { %150 = dma.vmem_to_hbm [thread:$0]  %s148_s1, 256, %s333_s3, [#allocation3]  }
 0x109   :  { %210 = dma.done.wait [#allocation3], 256  }
 0x10a   :  { %211 = vsyncadd [#allocation3], 4294967040 }
 0x10b   :  { %154 = vsyncpa [#allocation3], 1 }

</bundles_post_ra>
